<compile_context>
chip_gen: v7x
topology: tpu7x:2x2x1
jax: 0.10.0
libtpu: 0.0.40
codegen_flags: <defaults>
</compile_context>

<pallas_src>
import functools

import jax
import jax.numpy as jnp
import numpy as np
from jax.experimental import pallas as pl
from jax.experimental.pallas import tpu as pltpu


def _patch_matmul_kernel(a_ref, b_ref, o_ref):
    # a_ref: (tm, K) patch vectors   b_ref: (K, E) projection weight
    o_ref[...] = jnp.dot(
        a_ref[...], b_ref[...], preferred_element_type=jnp.float32
    ).astype(o_ref.dtype)


def _pick_row_tile(M, K, E, *, tm_max=4096, vmem_budget_bytes=24 * 1024 * 1024):
    """Largest MXU/VMEM-friendly row tile: multiple of 8, <= tm_max, and the
    double-buffered f32 lhs+out tiles stay under a conservative VMEM budget
    (safe vs. the 32 MiB default scoped limit on v6e/v7x and v5e's 16 MiB
    default would be the only chip needing a smaller budget — still fits:
    4096-row tiles use ~8 MiB here).  K<128 pads to 128 lanes in VMEM, so the
    budget uses max(K, 128) for the lhs footprint."""
    lanes_lhs = max(K, 128)
    bytes_per_row = (lanes_lhs + E) * 4 * 2  # f32, double-buffered lhs + out
    tm = min(tm_max, max(8, vmem_budget_bytes // max(bytes_per_row, 1)))
    tm = max(8, (tm // 8) * 8)
    # Don't use a tile (much) larger than the whole problem.
    tm = min(tm, max(8, ((M + 7) // 8) * 8))
    return tm


def _patch_matmul(patches, w_flat):
    """patches: (M, K) f32, w_flat: (K, E) f32 -> (M, E) f32 via Pallas."""
    M, K = patches.shape
    _, E = w_flat.shape
    tm = _pick_row_tile(M, K, E)

    return pl.pallas_call(
        _patch_matmul_kernel,
        out_shape=jax.ShapeDtypeStruct((M, E), jnp.float32),
        grid_spec=pltpu.PrefetchScalarGridSpec(
            num_scalar_prefetch=0,
            grid=(pl.cdiv(M, tm),),  # ragged last block: writes are masked
            in_specs=[
                # K = 3*p*p is small -> keep it whole (full-dim block, no pad).
                pl.BlockSpec((tm, K), lambda i: (i, 0)),
                # Weight block index is constant -> resident, DMA'd once.
                pl.BlockSpec((K, E), lambda i: (0, 0)),
            ],
            out_specs=pl.BlockSpec((tm, E), lambda i: (i, 0)),
        ),
        compiler_params=pltpu.CompilerParams(
            dimension_semantics=("parallel",),
        ),
        cost_estimate=pl.CostEstimate(
            flops=2 * M * K * E,
            transcendentals=0,
            bytes_accessed=(M * K + K * E + M * E) * 4,
        ),
    )(patches, w_flat)


@functools.partial(jax.jit, static_argnames=("patch_size",))
def conv_patcher_forward(x, weight, *, patch_size):
    """x: (B, 3, H, W) f32, weight: (E, 3, p, p) f32 -> (B, E, H/p, W/p) f32."""
    B, C, H, W = x.shape
    E = weight.shape[0]
    p = patch_size
    Hp, Wp = H // p, W // p

    # Extract non-overlapping patches: (B, C, Hp, p, Wp, p)
    xp = x.reshape(B, C, Hp, p, Wp, p)
    # -> (B, Hp, Wp, C, p, p): each patch vector ordered (c, kh, kw), matching
    # torch Conv2d weight.reshape(E, C*p*p).  Handled by XLA under this jit.
    xp = jnp.transpose(xp, (0, 2, 4, 1, 3, 5))
    patches = xp.reshape(B * Hp * Wp, C * p * p)

    w_flat = weight.reshape(E, C * p * p).T  # (K, E)

    out = _patch_matmul(patches, w_flat)     # (M, E)

    # Back to NCHW conv output: (B, E, Hp, Wp) — matches PyTorch module.
    # TODO(synk): downstream consumers that flatten to (B, Hp*Wp, E) could skip
    # this transpose and consume the kernel's lane-dense (M, E) layout directly.
    out = out.reshape(B, Hp, Wp, E)
    return jnp.transpose(out, (0, 3, 1, 2))


class ConvPatcher:
    """JAX/Pallas equivalent of the PyTorch conv_patcher module."""

    def __init__(self, embedding_dim=128, patch_size=4, key=None):
        self.embedding_dim = embedding_dim
        self.patch_size = patch_size
        if key is None:
            key = jax.random.PRNGKey(42)
        # Conv2d weight shape: (out_channels=E, in_channels=3, p, p), no bias.
        fan_in = 3 * patch_size * patch_size
        bound = 1.0 / np.sqrt(fan_in)
        self.weight = jax.random.uniform(
            key, (embedding_dim, 3, patch_size, patch_size),
            minval=-bound, maxval=bound, dtype=jnp.float32,
        )

    def __call__(self, x):
        return conv_patcher_forward(x, self.weight, patch_size=self.patch_size)


def _reference_conv(x, weight, patch_size):
    # Plain-JAX reference: strided conv == the PyTorch module's forward.
    return jax.lax.conv_general_dilated(
        x, weight,
        window_strides=(patch_size, patch_size),
        padding="VALID",
        dimension_numbers=("NCHW", "OIHW", "NCHW"),
    )


if __name__ == "__main__":
    key = jax.random.PRNGKey(0)
    k_x, k_w = jax.random.split(key)

    B, C, H, W = 2, 3, 16, 16
    patch_size = 4
    embedding_dim = 128

    x = jax.random.normal(k_x, (B, C, H, W), dtype=jnp.float32)

    model = ConvPatcher(embedding_dim=embedding_dim, patch_size=patch_size, key=k_w)

    out = model(x)
    out = jax.block_until_ready(out)

    assert out.shape == (B, embedding_dim, H // patch_size, W // patch_size), out.shape

    ref = jax.block_until_ready(_reference_conv(x, model.weight, patch_size))
    np.testing.assert_allclose(np.asarray(out), np.asarray(ref), rtol=1e-5, atol=1e-5)

    print("KERNEL_OK")
</pallas_src>

<mosaic_0001>
module attributes {stable_mosaic.version = 11 : i64} {
  func.func @_patch_matmul_kernel(%arg0: i32, %arg1: memref<32x48xf32, #tpu.memory_space<vmem>>, %arg2: memref<48x128xf32, #tpu.memory_space<vmem>>, %arg3: memref<32x128xf32, #tpu.memory_space<vmem>>) attributes {dimension_semantics = [#tpu.dimension_semantics<parallel>], iteration_bounds = array<i64: 1>, scalar_prefetch = 0 : i64, scratch_operands = 0 : i64, tpu.core_type = #tpu.core_type<tc>, window_params = [{transform_indices = @transform_0, window_bounds = array<i64: 32, 48>}, {pipeline_mode = #tpu.pipeline_mode<synchronous>, transform_indices = @transform_1, window_bounds = array<i64: 48, 128>}, {transform_indices = @transform_2, window_bounds = array<i64: 32, 128>}]} {
    %c0 = arith.constant 0 : index
    %c0_0 = arith.constant 0 : index
    %0 = vector.load %arg1[%c0, %c0_0] : memref<32x48xf32, #tpu.memory_space<vmem>>, vector<32x48xf32>
    %c0_1 = arith.constant 0 : index
    %c0_2 = arith.constant 0 : index
    %1 = vector.load %arg2[%c0_1, %c0_2] : memref<48x128xf32, #tpu.memory_space<vmem>>, vector<48x128xf32>
    %cst = arith.constant dense<0.000000e+00> : vector<32x128xf32>
    %2 = tpu.matmul %0, %1, %cst {dimension_numbers = #tpu.dot_dimension_numbers<[1], [0], [0], [1], [0, 0, 1, 1], [], []>} : vector<32x48xf32>, vector<48x128xf32>, vector<32x128xf32> -> vector<32x128xf32>
    %c0_3 = arith.constant 0 : index
    %c0_4 = arith.constant 0 : index
    %3 = vector.load %arg3[%c0_3, %c0_4] : memref<32x128xf32, #tpu.memory_space<vmem>>, vector<32x128xf32>
    tpu.vector_store %arg3[%c0_3, %c0_4], %2 {strides = array<i32>} : memref<32x128xf32, #tpu.memory_space<vmem>>, vector<32x128xf32>,
    return
  }
  func.func @transform_0(%arg0: i32) -> (i32, i32) {
    %c0_i32 = arith.constant 0 : i32
    %c0_i32_0 = arith.constant 0 : i32
    return %arg0, %c0_i32 : i32, i32
  }
  func.func @transform_1(%arg0: i32) -> (i32, i32) {
    %c0_i32 = arith.constant 0 : i32
    %c0_i32_0 = arith.constant 0 : i32
    %c0_i32_1 = arith.constant 0 : i32
    return %c0_i32, %c0_i32_0 : i32, i32
  }
  func.func @transform_2(%arg0: i32) -> (i32, i32) {
    %c0_i32 = arith.constant 0 : i32
    %c0_i32_0 = arith.constant 0 : i32
    return %arg0, %c0_i32 : i32, i32
  }
}

</mosaic_0001>

<bundles_post_ra>
// kernel: conv_patcher_forward.1
= control target key start
LH: loop header
LB: loop body
LE: loop exit
PB: predicated region body
PF: predicated region fallthrough
CT: control target
= control target key end

     0   :  { %vm22_vm0 = vcmask 392192   ;;  %s281_s0 = inlined_call_operand.vmem [shape: f32[32,48], index: 0, kind: input, shape index: {}]   ;;  %s282_s1 = inlined_call_operand.vmem [shape: f32[48,128], index: 1, kind: input, shape index: {}]   ;;  %s283_s2 = inlined_call_operand.hbm [shape: f32[32,128], index: 2, kind: output, shape index: {}]  }
   0x1   :  { %v16_v0 = vld [vmem:[%s282_s1] sm:$0xff]  ;;  %v17_v1 = vld [vmem:[%s282_s1 + $0x8] sm:$0xff]  ;;  %v18_v2 = vld [vmem:[%s282_s1 + $0x10] sm:$0xff] }
   0x2   :  { %v172_v3 = vpack.c.bf16 %v17_v1, %v16_v0  ;;  %v19_v4 = vld [vmem:[%s282_s1 + $0x18] sm:$0xff]  ;;  %v20_v6 = vld [vmem:[%s282_s1 + $0x20] sm:$0xff]  ;;  %v21_v7 = vld [vmem:[%s282_s1 + $0x28] sm:$0xff] }
   0x3   :  { %v176_v5 = vpack.c.bf16 %v19_v4, %v18_v2  ;;  %v12_v8 = vld [vmem:[%s281_s0] sm:$0xff]  ;;  %v14_v9 = vld [vmem:[%s281_s0 + $0x10] sm:$0xff] }
   0x4   :  { %173 = vmatprep.subr.bf16.mxu0 %v172_v3  ;;  %184 = vmatprep.subr.bf16.mxu1 %v172_v3 }
   0x5   :  { %7 = vsyncpa [#allocation3], 0  ;;  %175 = vmatpush3.bf16.msra.mxu0 %v172_v3  ;;  %187 = vmatpush3.bf16.msra.mxu1 %v172_v3  ;;  %v180_v10 = vpack.c.bf16 %v21_v7, %v20_v6  ;;  %v13_v11 = vld [vmem:[%s281_s0 + $0x8] sm:$0xff]  ;;  %v15_v12 = vld [vmem:[%s281_s0 + $0x18] sm:$0xff]  ;;  %s217_s28 = smov [#allocation2]  }
   0x6   :  { %177 = vmatprep.subr.bf16.mxu0 %v176_v5  ;;  %185 = vmatprep.subr.bf16.mxu1 %v176_v5  ;;  %s129_s29 = sshll.u32 %s217_s28, 4  ;;  %s130_s29 = int_to_ptr.vmem [resolvable:$true] %s129_s29 }
   0x7   :  { %166 = vmatprep.mubr.msk.f32.mxu0 %vm22_vm0, %v12_v8  ;;  %169 = vmatprep.mubr.msk.f32.mxu1 %vm22_vm0, %v14_v9  ;;  %s193_s30 = scalar_lea.vmem %s130_s29, 512  ;;  %p198_p1 = scmp.lt.s32.totalorder %s130_s29, %s130_s29 }
   0x8   :  { %p194_p0 = scmp.ne.s32.totalorder %s130_s29, %s193_s30  ;;  %p199_p2 = scmp.lt.s32.totalorder %s193_s30, %s193_s30 }
   0x9   :  { %179 = vmatpush3.bf16.msra.mxu0 %v176_v5  ;;  %188 = vmatpush3.bf16.msra.mxu1 %v176_v5 }
   0xa   :  { %181 = vmatprep.subr.bf16.mxu0 %v180_v10  ;;  %186 = vmatprep.subr.bf16.mxu1 %v180_v10  ;;  %p200_p3 = por %p199_p2, %p198_p1 }
   0xc   :  { %p201_p4 = pnand %p200_p3, %p194_p0 }
   0xd   :  { %183 = vmatpush3.bf16.msra.mxu0 %v180_v10  ;;  %189 = vmatpush3.bf16.msra.mxu1 %v180_v10 }
  0x10   :  { %167 = vmatmul.mubr.msk.f32.vlgmr.msra.gmra.mrb[0].mxu0 %vm22_vm0, %v13_v11  ;;  %170 = vmatmul.mubr.msk.f32.vlgmr.msra.gmra.mrb[0].mxu1 %vm22_vm0, %v15_v12 }
  0xe3   :  { %v168_v13 = vpop.f32.mrb[0].mxu0  ;;  %v171_v14 = vpop.f32.mrb[0].mxu1 }
  0xe4   :  { %121 = vst [vmem:[#allocation2 + $0x8] sm:$0xff] %v168_v13  ;;  %123 = vst [vmem:[#allocation2 + $0x18] sm:$0xff] %v171_v14  ;;  %v101_v15 = vpop.f32.mrb[1].mxu0  ;;  %v111_v16 = vpop.f32.mrb[1].mxu1 }
  0xe5   :  { %120 = vst [vmem:[#allocation2] sm:$0xff] %v101_v15  ;;  %122 = vst [vmem:[#allocation2 + $0x10] sm:$0xff] %v111_v16 }
  0xe6   :  { %204 = shalt.err (!%p201_p4)
}
  0xe7   :  { %s205_s4 = scalar_lea.hbm %s283_s2, 512 }
  0xe8   :  { %p206_p5 = scmp.ne.s32.totalorder %s283_s2, %s205_s4  ;;  %p209_p6 = scmp.lt.u32.totalorder %s205_s4, %s283_s2 }
  0xea   :  { %p211_p7 = pnand %p209_p6, %p206_p5 }
  0xec   :  { %214 = shalt.err (!%p211_p7)
}
  0xed   :  { %s218_s9 = smov 128   ;;  %s219_s10 = smov 8  }
  0xee   :  { %135 = dma.vmem_to_hbm [thread:$0]  %s130_s29, 512, %s283_s2, [#allocation3], %s218_s9, %s218_s9, %s219_s10  }
  0xef   :  { %215 = dma.done.wait [#allocation3], 512  }
  0xf0   :  { %216 = vsyncadd [#allocation3], 4294966784 }
  0xf1   :  { %139 = vsyncpa [#allocation3], 1 }

</bundles_post_ra>
